<compile_context>
chip_gen: v6e
topology: v6e:2x2x1
jax: 0.10.0
libtpu: 0.0.40
codegen_flags: <defaults>
</compile_context>

<pallas_src>
import functools

import jax
import jax.numpy as jnp
from jax.experimental import pallas as pl
from jax.experimental.pallas import tpu as pltpu

Q_MAX_16 = 2.0 ** 15 - 1
Q_MIN_16 = -(2.0 ** 15)
Q_MAX_8 = 2.0 ** 7 - 1
Q_MIN_8 = -(2.0 ** 7)


def _quant(v, inv_s, s, qmin, qmax):
    # quant(v, s) = hardtanh(round(v / s), qmin, qmax) * s ; divide replaced by
    # multiply with the precomputed reciprocal (exact for power-of-two scales).
    return jnp.clip(jnp.round(v * inv_s), qmin, qmax) * s


def _fused_block_kernel(x_ref, coords_ref, w1_ref, w2_ref, prm_ref, o_ref, *,
                        H, W, c_s1, x_s1, c_s2, x_s2, a_s):
    """One image: conv1+quant+relu, conv2+quant, bn/residual, quant8(A_s), relu."""
    hw = H * W
    xin = x_ref[0]                      # [C, H*W]  (also the residual identity)
    coords = coords_ref[...]            # [2, H*W] int32: row 0 = y, row 1 = x
    yy = coords[0:1, :]
    xx = coords[1:2, :]

    # Boundary masks for the 9 (dy, dx) taps, computed once and reused by both convs.
    masks = []
    for dy in range(3):
        for dx in range(3):
            masks.append((yy >= 1 - dy) & (yy < H + 1 - dy) &
                         (xx >= 1 - dx) & (xx < W + 1 - dx))

    def conv3x3(a, w):
        # a: [C, H*W] for one whole image; builds [9C, H*W] patches in VMEM via
        # masked cyclic lane rotations (wrapped-around elements are always masked
        # to zero, so the rotation is equivalent to a zero-padded shift).
        blocks = []
        k = 0
        for dy in range(3):
            for dx in range(3):
                off = (dy - 1) * W + (dx - 1)
                if off == 0:
                    sh = a
                else:
                    sh = pltpu.roll(a, shift=(-off) % hw, axis=1)
                blocks.append(jnp.where(masks[k], sh, 0.0))
                k += 1
        patches = jnp.concatenate(blocks, axis=0)        # [9C, H*W]
        return jnp.dot(w, patches, preferred_element_type=jnp.float32)

    prm = prm_ref[...]                  # [planes, 4]
    b1 = prm[:, 0:1]
    b2 = prm[:, 1:2]
    bnx = prm[:, 2:3]
    bny = prm[:, 3:4]

    # conv1 + quant16 (bias-free accumulator) + bias + quant8 + relu
    acc1 = conv3x3(xin, w1_ref[...])
    o1 = _quant(acc1, 1.0 / c_s1, c_s1, Q_MIN_16, Q_MAX_16)
    o1 = _quant(o1 + b1, 1.0 / x_s1, x_s1, Q_MIN_8, Q_MAX_8)
    o1 = jnp.maximum(o1, 0.0)

    # conv2 + quant chain (intermediate never leaves VMEM)
    acc2 = conv3x3(o1, w2_ref[...])
    o2 = _quant(acc2, 1.0 / c_s2, c_s2, Q_MIN_16, Q_MAX_16)
    o2 = _quant(o2 + b2, 1.0 / x_s2, x_s2, Q_MIN_8, Q_MAX_8)

    # bn scaling, residual add, quant8(A_s), relu
    res = o2 * bnx + xin * bny
    out = _quant(res, 1.0 / a_s, a_s, Q_MIN_8, Q_MAX_8)
    o_ref[0] = jnp.maximum(out, 0.0).astype(o_ref.dtype)


@functools.partial(
    jax.jit, static_argnames=("c_s1", "x_s1", "c_s2", "x_s2", "a_s"))
def basic_block(x, w1, b1, w2, b2, bn_x, bn_y, *, c_s1, x_s1, c_s2, x_s2, a_s):
    """BasicBlock.forward with QUANT=True and calibrated power-of-two scales.

    x: [N, C, H, W] f32; w1/w2: [planes, C, 3, 3]; b1/b2, bn_x, bn_y: [planes].
    Requires C == planes (residual add), as the module's usage implies.
    """
    n, c_in, h, w = x.shape
    planes = w1.shape[0]
    assert c_in == planes, "residual add requires inplanes == planes"
    hw = h * w

    # Host glue is just reshapes + tiny constant tables (no im2col, no padding).
    x3 = x.reshape(n, c_in, hw).astype(jnp.float32)                   # [N, C, HW]
    # Weight laid out so patch row order (k = dy*3+dx major, channel minor) matches.
    w1m = jnp.transpose(w1, (0, 2, 3, 1)).reshape(planes, 9 * c_in).astype(jnp.float32)
    w2m = jnp.transpose(w2, (0, 2, 3, 1)).reshape(planes, 9 * planes).astype(jnp.float32)
    params = jnp.stack([b1, b2, bn_x, bn_y], axis=1).astype(jnp.float32)  # [planes, 4]
    m_idx = jnp.arange(hw, dtype=jnp.int32)
    coords = jnp.stack([m_idx // w, m_idx % w], axis=0)               # [2, HW] (y, x)

    kernel = functools.partial(
        _fused_block_kernel, H=h, W=w,
        c_s1=c_s1, x_s1=x_s1, c_s2=c_s2, x_s2=x_s2, a_s=a_s)

    out = pl.pallas_call(
        kernel,
        out_shape=jax.ShapeDtypeStruct((n, planes, hw), jnp.float32),
        grid_spec=pltpu.PrefetchScalarGridSpec(
            num_scalar_prefetch=0,
            grid=(n,),                                                 # one image / step
            in_specs=[
                pl.BlockSpec((1, c_in, hw), lambda i: (i, 0, 0)),      # activation tile
                pl.BlockSpec((2, hw), lambda i: (0, 0)),               # (y, x) coords
                pl.BlockSpec((planes, 9 * c_in), lambda i: (0, 0)),    # conv1 weight
                pl.BlockSpec((planes, 9 * planes), lambda i: (0, 0)),  # conv2 weight
                pl.BlockSpec((planes, 4), lambda i: (0, 0)),           # b1|b2|bn_x|bn_y
            ],
            out_specs=pl.BlockSpec((1, planes, hw), lambda i: (i, 0, 0)),
        ),
        compiler_params=pltpu.CompilerParams(
            dimension_semantics=("parallel",)),                        # 2 TCs on v7x
    )(x3, coords, w1m, w2m, params)

    return out.reshape(n, planes, h, w)                                # back to NCHW


def _reference(x, w1, b1, w2, b2, bn_x, bn_y, *, c_s1, x_s1, c_s2, x_s2, a_s):
    """Plain-JAX reference of BasicBlock.forward (QUANT=True)."""
    def q(v, s, qmin, qmax):
        return jnp.clip(jnp.round(v / s), qmin, qmax) * s

    def qconv(xin, wt, bs, c_s, x_s):
        conv = jax.lax.conv_general_dilated(
            xin, wt, window_strides=(1, 1), padding=((1, 1), (1, 1)),
            dimension_numbers=("NCHW", "OIHW", "NCHW"))
        q16 = q(conv, c_s, Q_MIN_16, Q_MAX_16)        # conv w/o bias == x - bias
        xb = q16 + bs.reshape(1, -1, 1, 1)
        return q(xb, x_s, Q_MIN_8, Q_MAX_8)

    out = qconv(x, w1, b1, c_s1, x_s1)
    identity = x
    out = jnp.maximum(out, 0.0)
    out = qconv(out, w2, b2, c_s2, x_s2)
    out = out * bn_x.reshape(1, -1, 1, 1)
    identity = identity * bn_y.reshape(1, -1, 1, 1)
    out = out + identity
    out = q(out, a_s, Q_MIN_8, Q_MAX_8)
    return jnp.maximum(out, 0.0)


if __name__ == "__main__":
    key = jax.random.PRNGKey(0)
    kx, kw1, kb1, kw2, kb2, kbn = jax.random.split(key, 6)

    # BasicBlock(inplanes=planes=8); batch=2, spatial 16x16.
    n, planes, h, w = 2, 8, 16, 16

    x = jax.random.normal(kx, (n, planes, h, w), dtype=jnp.float32)
    w1 = 0.1 * jax.random.normal(kw1, (planes, planes, 3, 3), dtype=jnp.float32)
    b1 = 0.1 * jax.random.normal(kb1, (planes,), dtype=jnp.float32)
    w2 = 0.1 * jax.random.normal(kw2, (planes, planes, 3, 3), dtype=jnp.float32)
    b2 = 0.1 * jax.random.normal(kb2, (planes,), dtype=jnp.float32)
    kbnx, kbny = jax.random.split(kbn)
    bn_x = jax.random.uniform(kbnx, (planes,), jnp.float32, 0.5, 1.5)
    bn_y = jax.random.uniform(kbny, (planes,), jnp.float32, 0.5, 1.5)

    # Calibrated power-of-two scales (the module defaults of 0 are degenerate
    # and only overwritten during a SAVE_FM calibration pass).
    scales = dict(c_s1=2.0 ** -12, x_s1=2.0 ** -4,
                  c_s2=2.0 ** -12, x_s2=2.0 ** -4, a_s=2.0 ** -4)

    out = basic_block(x, w1, b1, w2, b2, bn_x, bn_y, **scales)
    out = jax.block_until_ready(out)
    ref = _reference(x, w1, b1, w2, b2, bn_x, bn_y, **scales)

    assert out.shape == (n, planes, h, w)
    # Outputs live on the a_s quant grid; a one-ulp difference between the
    # Pallas MXU accumulator and XLA's conv accumulator can flip a rounding
    # boundary and move an isolated element by one quant code.  Require that
    # essentially all elements match exactly and any stragglers stay within a
    # couple of quant steps (a real layout/scale/bias/shift bug perturbs far more).
    diff = jnp.abs(out - ref)
    mismatch_frac = float(jnp.mean((diff > 1e-4).astype(jnp.float32)))
    assert mismatch_frac < 0.01, f"mismatch fraction too high: {mismatch_frac}"
    assert float(jnp.max(diff)) < 0.5, f"max diff too large: {float(jnp.max(diff))}"

    print("KERNEL_OK")
</pallas_src>

<mosaic_0001>
module attributes {stable_mosaic.version = 11 : i64} {
  func.func @_fused_block_kernel(%arg0: i32, %arg1: memref<1x8x256xf32, #tpu.memory_space<vmem>>, %arg2: memref<2x256xi32, #tpu.memory_space<vmem>>, %arg3: memref<8x72xf32, #tpu.memory_space<vmem>>, %arg4: memref<8x72xf32, #tpu.memory_space<vmem>>, %arg5: memref<8x4xf32, #tpu.memory_space<vmem>>, %arg6: memref<1x8x256xf32, #tpu.memory_space<vmem>>) attributes {dimension_semantics = [#tpu.dimension_semantics<parallel>], iteration_bounds = array<i64: 2>, scalar_prefetch = 0 : i64, scratch_operands = 0 : i64, tpu.core_type = #tpu.core_type<tc>, window_params = [{transform_indices = @transform_0, window_bounds = array<i64: 1, 8, 256>}, {pipeline_mode = #tpu.pipeline_mode<synchronous>, transform_indices = @transform_1, window_bounds = array<i64: 2, 256>}, {pipeline_mode = #tpu.pipeline_mode<synchronous>, transform_indices = @transform_2, window_bounds = array<i64: 8, 72>}, {pipeline_mode = #tpu.pipeline_mode<synchronous>, transform_indices = @transform_3, window_bounds = array<i64: 8, 72>}, {pipeline_mode = #tpu.pipeline_mode<synchronous>, transform_indices = @transform_4, window_bounds = array<i64: 8, 4>}, {transform_indices = @transform_5, window_bounds = array<i64: 1, 8, 256>}]} {
    %c0 = arith.constant 0 : index
    %c0_0 = arith.constant 0 : index
    %c0_1 = arith.constant 0 : index
    %0 = vector.load %arg1[%c0, %c0_0, %c0_1] : memref<1x8x256xf32, #tpu.memory_space<vmem>>, vector<1x8x256xf32>
    %1 = vector.shape_cast %0 : vector<1x8x256xf32> to vector<8x256xf32>
    %c0_2 = arith.constant 0 : index
    %c0_3 = arith.constant 0 : index
    %2 = vector.load %arg2[%c0_2, %c0_3] : memref<2x256xi32, #tpu.memory_space<vmem>>, vector<2x256xi32>
    %3 = vector.extract_strided_slice %2 {offsets = [0, 0], sizes = [1, 256], strides = [1, 1]} : vector<2x256xi32> to vector<1x256xi32>
    %4 = vector.extract_strided_slice %2 {offsets = [1, 0], sizes = [1, 256], strides = [1, 1]} : vector<2x256xi32> to vector<1x256xi32>
    %c1_i32 = arith.constant 1 : i32
    %5 = vector.broadcast %c1_i32 : i32 to vector<1x256xi32>
    %6 = arith.cmpi sge, %3, %5 : vector<1x256xi32>
    %c17_i32 = arith.constant 17 : i32
    %7 = vector.broadcast %c17_i32 : i32 to vector<1x256xi32>
    %8 = arith.cmpi slt, %3, %7 : vector<1x256xi32>
    %9 = arith.andi %6, %8 : vector<1x256xi1>
    %c1_i32_4 = arith.constant 1 : i32
    %10 = vector.broadcast %c1_i32_4 : i32 to vector<1x256xi32>
    %11 = arith.cmpi sge, %4, %10 : vector<1x256xi32>
    %12 = arith.andi %9, %11 : vector<1x256xi1>
    %c17_i32_5 = arith.constant 17 : i32
    %13 = vector.broadcast %c17_i32_5 : i32 to vector<1x256xi32>
    %14 = arith.cmpi slt, %4, %13 : vector<1x256xi32>
    %15 = arith.andi %12, %14 : vector<1x256xi1>
    %c1_i32_6 = arith.constant 1 : i32
    %16 = vector.broadcast %c1_i32_6 : i32 to vector<1x256xi32>
    %17 = arith.cmpi sge, %3, %16 : vector<1x256xi32>
    %c17_i32_7 = arith.constant 17 : i32
    %18 = vector.broadcast %c17_i32_7 : i32 to vector<1x256xi32>
    %19 = arith.cmpi slt, %3, %18 : vector<1x256xi32>
    %20 = arith.andi %17, %19 : vector<1x256xi1>
    %c0_i32 = arith.constant 0 : i32
    %21 = vector.broadcast %c0_i32 : i32 to vector<1x256xi32>
    %22 = arith.cmpi sge, %4, %21 : vector<1x256xi32>
    %23 = arith.andi %20, %22 : vector<1x256xi1>
    %c16_i32 = arith.constant 16 : i32
    %24 = vector.broadcast %c16_i32 : i32 to vector<1x256xi32>
    %25 = arith.cmpi slt, %4, %24 : vector<1x256xi32>
    %26 = arith.andi %23, %25 : vector<1x256xi1>
    %c1_i32_8 = arith.constant 1 : i32
    %27 = vector.broadcast %c1_i32_8 : i32 to vector<1x256xi32>
    %28 = arith.cmpi sge, %3, %27 : vector<1x256xi32>
    %c17_i32_9 = arith.constant 17 : i32
    %29 = vector.broadcast %c17_i32_9 : i32 to vector<1x256xi32>
    %30 = arith.cmpi slt, %3, %29 : vector<1x256xi32>
    %31 = arith.andi %28, %30 : vector<1x256xi1>
    %c-1_i32 = arith.constant -1 : i32
    %32 = vector.broadcast %c-1_i32 : i32 to vector<1x256xi32>
    %33 = arith.cmpi sge, %4, %32 : vector<1x256xi32>
    %34 = arith.andi %31, %33 : vector<1x256xi1>
    %c15_i32 = arith.constant 15 : i32
    %35 = vector.broadcast %c15_i32 : i32 to vector<1x256xi32>
    %36 = arith.cmpi slt, %4, %35 : vector<1x256xi32>
    %37 = arith.andi %34, %36 : vector<1x256xi1>
    %c0_i32_10 = arith.constant 0 : i32
    %38 = vector.broadcast %c0_i32_10 : i32 to vector<1x256xi32>
    %39 = arith.cmpi sge, %3, %38 : vector<1x256xi32>
    %c16_i32_11 = arith.constant 16 : i32
    %40 = vector.broadcast %c16_i32_11 : i32 to vector<1x256xi32>
    %41 = arith.cmpi slt, %3, %40 : vector<1x256xi32>
    %42 = arith.andi %39, %41 : vector<1x256xi1>
    %c1_i32_12 = arith.constant 1 : i32
    %43 = vector.broadcast %c1_i32_12 : i32 to vector<1x256xi32>
    %44 = arith.cmpi sge, %4, %43 : vector<1x256xi32>
    %45 = arith.andi %42, %44 : vector<1x256xi1>
    %c17_i32_13 = arith.constant 17 : i32
    %46 = vector.broadcast %c17_i32_13 : i32 to vector<1x256xi32>
    %47 = arith.cmpi slt, %4, %46 : vector<1x256xi32>
    %48 = arith.andi %45, %47 : vector<1x256xi1>
    %c0_i32_14 = arith.constant 0 : i32
    %49 = vector.broadcast %c0_i32_14 : i32 to vector<1x256xi32>
    %50 = arith.cmpi sge, %3, %49 : vector<1x256xi32>
    %c16_i32_15 = arith.constant 16 : i32
    %51 = vector.broadcast %c16_i32_15 : i32 to vector<1x256xi32>
    %52 = arith.cmpi slt, %3, %51 : vector<1x256xi32>
    %53 = arith.andi %50, %52 : vector<1x256xi1>
    %c0_i32_16 = arith.constant 0 : i32
    %54 = vector.broadcast %c0_i32_16 : i32 to vector<1x256xi32>
    %55 = arith.cmpi sge, %4, %54 : vector<1x256xi32>
    %56 = arith.andi %53, %55 : vector<1x256xi1>
    %c16_i32_17 = arith.constant 16 : i32
    %57 = vector.broadcast %c16_i32_17 : i32 to vector<1x256xi32>
    %58 = arith.cmpi slt, %4, %57 : vector<1x256xi32>
    %59 = arith.andi %56, %58 : vector<1x256xi1>
    %c0_i32_18 = arith.constant 0 : i32
    %60 = vector.broadcast %c0_i32_18 : i32 to vector<1x256xi32>
    %61 = arith.cmpi sge, %3, %60 : vector<1x256xi32>
    %c16_i32_19 = arith.constant 16 : i32
    %62 = vector.broadcast %c16_i32_19 : i32 to vector<1x256xi32>
    %63 = arith.cmpi slt, %3, %62 : vector<1x256xi32>
    %64 = arith.andi %61, %63 : vector<1x256xi1>
    %c-1_i32_20 = arith.constant -1 : i32
    %65 = vector.broadcast %c-1_i32_20 : i32 to vector<1x256xi32>
    %66 = arith.cmpi sge, %4, %65 : vector<1x256xi32>
    %67 = arith.andi %64, %66 : vector<1x256xi1>
    %c15_i32_21 = arith.constant 15 : i32
    %68 = vector.broadcast %c15_i32_21 : i32 to vector<1x256xi32>
    %69 = arith.cmpi slt, %4, %68 : vector<1x256xi32>
    %70 = arith.andi %67, %69 : vector<1x256xi1>
    %c-1_i32_22 = arith.constant -1 : i32
    %71 = vector.broadcast %c-1_i32_22 : i32 to vector<1x256xi32>
    %72 = arith.cmpi sge, %3, %71 : vector<1x256xi32>
    %c15_i32_23 = arith.constant 15 : i32
    %73 = vector.broadcast %c15_i32_23 : i32 to vector<1x256xi32>
    %74 = arith.cmpi slt, %3, %73 : vector<1x256xi32>
    %75 = arith.andi %72, %74 : vector<1x256xi1>
    %c1_i32_24 = arith.constant 1 : i32
    %76 = vector.broadcast %c1_i32_24 : i32 to vector<1x256xi32>
    %77 = arith.cmpi sge, %4, %76 : vector<1x256xi32>
    %78 = arith.andi %75, %77 : vector<1x256xi1>
    %c17_i32_25 = arith.constant 17 : i32
    %79 = vector.broadcast %c17_i32_25 : i32 to vector<1x256xi32>
    %80 = arith.cmpi slt, %4, %79 : vector<1x256xi32>
    %81 = arith.andi %78, %80 : vector<1x256xi1>
    %c-1_i32_26 = arith.constant -1 : i32
    %82 = vector.broadcast %c-1_i32_26 : i32 to vector<1x256xi32>
    %83 = arith.cmpi sge, %3, %82 : vector<1x256xi32>
    %c15_i32_27 = arith.constant 15 : i32
    %84 = vector.broadcast %c15_i32_27 : i32 to vector<1x256xi32>
    %85 = arith.cmpi slt, %3, %84 : vector<1x256xi32>
    %86 = arith.andi %83, %85 : vector<1x256xi1>
    %c0_i32_28 = arith.constant 0 : i32
    %87 = vector.broadcast %c0_i32_28 : i32 to vector<1x256xi32>
    %88 = arith.cmpi sge, %4, %87 : vector<1x256xi32>
    %89 = arith.andi %86, %88 : vector<1x256xi1>
    %c16_i32_29 = arith.constant 16 : i32
    %90 = vector.broadcast %c16_i32_29 : i32 to vector<1x256xi32>
    %91 = arith.cmpi slt, %4, %90 : vector<1x256xi32>
    %92 = arith.andi %89, %91 : vector<1x256xi1>
    %c-1_i32_30 = arith.constant -1 : i32
    %93 = vector.broadcast %c-1_i32_30 : i32 to vector<1x256xi32>
    %94 = arith.cmpi sge, %3, %93 : vector<1x256xi32>
    %c15_i32_31 = arith.constant 15 : i32
    %95 = vector.broadcast %c15_i32_31 : i32 to vector<1x256xi32>
    %96 = arith.cmpi slt, %3, %95 : vector<1x256xi32>
    %97 = arith.andi %94, %96 : vector<1x256xi1>
    %c-1_i32_32 = arith.constant -1 : i32
    %98 = vector.broadcast %c-1_i32_32 : i32 to vector<1x256xi32>
    %99 = arith.cmpi sge, %4, %98 : vector<1x256xi32>
    %100 = arith.andi %97, %99 : vector<1x256xi1>
    %c15_i32_33 = arith.constant 15 : i32
    %101 = vector.broadcast %c15_i32_33 : i32 to vector<1x256xi32>
    %102 = arith.cmpi slt, %4, %101 : vector<1x256xi32>
    %103 = arith.andi %100, %102 : vector<1x256xi1>
    %c0_34 = arith.constant 0 : index
    %c0_35 = arith.constant 0 : index
    %104 = vector.load %arg5[%c0_34, %c0_35] : memref<8x4xf32, #tpu.memory_space<vmem>>, vector<8x4xf32>
    %105 = vector.extract_strided_slice %104 {offsets = [0, 0], sizes = [8, 1], strides = [1, 1]} : vector<8x4xf32> to vector<8x1xf32>
    %106 = vector.extract_strided_slice %104 {offsets = [0, 1], sizes = [8, 1], strides = [1, 1]} : vector<8x4xf32> to vector<8x1xf32>
    %107 = vector.extract_strided_slice %104 {offsets = [0, 2], sizes = [8, 1], strides = [1, 1]} : vector<8x4xf32> to vector<8x1xf32>
    %108 = vector.extract_strided_slice %104 {offsets = [0, 3], sizes = [8, 1], strides = [1, 1]} : vector<8x4xf32> to vector<8x1xf32>
    %c0_36 = arith.constant 0 : index
    %c0_37 = arith.constant 0 : index
    %109 = vector.load %arg3[%c0_36, %c0_37] : memref<8x72xf32, #tpu.memory_space<vmem>>, vector<8x72xf32>
    %c17_i32_38 = arith.constant 17 : i32
    %110 = tpu.dynamic_rotate %1 by %c17_i32_38 dim 1 : vector<8x256xf32>, i32 -> vector<8x256xf32>
    %cst = arith.constant 0.000000e+00 : f32
    %111 = vector.shape_cast %15 : vector<1x256xi1> to vector<1x256xi1>
    %112 = vector.broadcast %111 : vector<1x256xi1> to vector<8x256xi1>
    %113 = vector.broadcast %cst : f32 to vector<8x256xf32>
    %114 = arith.select %112, %110, %113 : vector<8x256xi1>, vector<8x256xf32>
    %c16_i32_39 = arith.constant 16 : i32
    %115 = tpu.dynamic_rotate %1 by %c16_i32_39 dim 1 : vector<8x256xf32>, i32 -> vector<8x256xf32>
    %cst_40 = arith.constant 0.000000e+00 : f32
    %116 = vector.shape_cast %26 : vector<1x256xi1> to vector<1x256xi1>
    %117 = vector.broadcast %116 : vector<1x256xi1> to vector<8x256xi1>
    %118 = vector.broadcast %cst_40 : f32 to vector<8x256xf32>
    %119 = arith.select %117, %115, %118 : vector<8x256xi1>, vector<8x256xf32>
    %c15_i32_41 = arith.constant 15 : i32
    %120 = tpu.dynamic_rotate %1 by %c15_i32_41 dim 1 : vector<8x256xf32>, i32 -> vector<8x256xf32>
    %cst_42 = arith.constant 0.000000e+00 : f32
    %121 = vector.shape_cast %37 : vector<1x256xi1> to vector<1x256xi1>
    %122 = vector.broadcast %121 : vector<1x256xi1> to vector<8x256xi1>
    %123 = vector.broadcast %cst_42 : f32 to vector<8x256xf32>
    %124 = arith.select %122, %120, %123 : vector<8x256xi1>, vector<8x256xf32>
    %c1_i32_43 = arith.constant 1 : i32
    %125 = tpu.dynamic_rotate %1 by %c1_i32_43 dim 1 : vector<8x256xf32>, i32 -> vector<8x256xf32>
    %cst_44 = arith.constant 0.000000e+00 : f32
    %126 = vector.shape_cast %48 : vector<1x256xi1> to vector<1x256xi1>
    %127 = vector.broadcast %126 : vector<1x256xi1> to vector<8x256xi1>
    %128 = vector.broadcast %cst_44 : f32 to vector<8x256xf32>
    %129 = arith.select %127, %125, %128 : vector<8x256xi1>, vector<8x256xf32>
    %cst_45 = arith.constant 0.000000e+00 : f32
    %130 = vector.shape_cast %59 : vector<1x256xi1> to vector<1x256xi1>
    %131 = vector.broadcast %130 : vector<1x256xi1> to vector<8x256xi1>
    %132 = vector.broadcast %cst_45 : f32 to vector<8x256xf32>
    %133 = arith.select %131, %1, %132 : vector<8x256xi1>, vector<8x256xf32>
    %c255_i32 = arith.constant 255 : i32
    %134 = tpu.dynamic_rotate %1 by %c255_i32 dim 1 : vector<8x256xf32>, i32 -> vector<8x256xf32>
    %cst_46 = arith.constant 0.000000e+00 : f32
    %135 = vector.shape_cast %70 : vector<1x256xi1> to vector<1x256xi1>
    %136 = vector.broadcast %135 : vector<1x256xi1> to vector<8x256xi1>
    %137 = vector.broadcast %cst_46 : f32 to vector<8x256xf32>
    %138 = arith.select %136, %134, %137 : vector<8x256xi1>, vector<8x256xf32>
    %c241_i32 = arith.constant 241 : i32
    %139 = tpu.dynamic_rotate %1 by %c241_i32 dim 1 : vector<8x256xf32>, i32 -> vector<8x256xf32>
    %cst_47 = arith.constant 0.000000e+00 : f32
    %140 = vector.shape_cast %81 : vector<1x256xi1> to vector<1x256xi1>
    %141 = vector.broadcast %140 : vector<1x256xi1> to vector<8x256xi1>
    %142 = vector.broadcast %cst_47 : f32 to vector<8x256xf32>
    %143 = arith.select %141, %139, %142 : vector<8x256xi1>, vector<8x256xf32>
    %c240_i32 = arith.constant 240 : i32
    %144 = tpu.dynamic_rotate %1 by %c240_i32 dim 1 : vector<8x256xf32>, i32 -> vector<8x256xf32>
    %cst_48 = arith.constant 0.000000e+00 : f32
    %145 = vector.shape_cast %92 : vector<1x256xi1> to vector<1x256xi1>
    %146 = vector.broadcast %145 : vector<1x256xi1> to vector<8x256xi1>
    %147 = vector.broadcast %cst_48 : f32 to vector<8x256xf32>
    %148 = arith.select %146, %144, %147 : vector<8x256xi1>, vector<8x256xf32>
    %c239_i32 = arith.constant 239 : i32
    %149 = tpu.dynamic_rotate %1 by %c239_i32 dim 1 : vector<8x256xf32>, i32 -> vector<8x256xf32>
    %cst_49 = arith.constant 0.000000e+00 : f32
    %150 = vector.shape_cast %103 : vector<1x256xi1> to vector<1x256xi1>
    %151 = vector.broadcast %150 : vector<1x256xi1> to vector<8x256xi1>
    %152 = vector.broadcast %cst_49 : f32 to vector<8x256xf32>
    %153 = arith.select %151, %149, %152 : vector<8x256xi1>, vector<8x256xf32>
    %154 = tpu.concatenate %114, %119, %124, %129, %133, %138, %143, %148, %153 in 0 : vector<8x256xf32>, vector<8x256xf32>, vector<8x256xf32>, vector<8x256xf32>, vector<8x256xf32>, vector<8x256xf32>, vector<8x256xf32>, vector<8x256xf32>, vector<8x256xf32> -> vector<72x256xf32>
    %cst_50 = arith.constant dense<0.000000e+00> : vector<8x256xf32>
    %155 = tpu.matmul %109, %154, %cst_50 {dimension_numbers = #tpu.dot_dimension_numbers<[1], [0], [0], [1], [0, 0, 1, 1], [], []>} : vector<8x72xf32>, vector<72x256xf32>, vector<8x256xf32> -> vector<8x256xf32>
    %cst_51 = arith.constant 4.096000e+03 : f32
    %156 = vector.broadcast %cst_51 : f32 to vector<8x256xf32>
    %157 = arith.mulf %155, %156 : vector<8x256xf32>
    %158 = math.roundeven %157 : vector<8x256xf32>
    %cst_52 = arith.constant -3.276800e+04 : f32
    %cst_53 = arith.constant 3.276700e+04 : f32
    %159 = vector.broadcast %cst_52 : f32 to vector<8x256xf32>
    %160 = arith.maximumf %159, %158 : vector<8x256xf32>
    %161 = vector.broadcast %cst_53 : f32 to vector<8x256xf32>
    %162 = arith.minimumf %161, %160 : vector<8x256xf32>
    %cst_54 = arith.constant 2.44140625E-4 : f32
    %163 = vector.broadcast %cst_54 : f32 to vector<8x256xf32>
    %164 = arith.mulf %162, %163 : vector<8x256xf32>
    %165 = vector.broadcast %105 : vector<8x1xf32> to vector<8x256xf32>
    %166 = arith.addf %164, %165 : vector<8x256xf32>
    %cst_55 = arith.constant 1.600000e+01 : f32
    %167 = vector.broadcast %cst_55 : f32 to vector<8x256xf32>
    %168 = arith.mulf %166, %167 : vector<8x256xf32>
    %169 = math.roundeven %168 : vector<8x256xf32>
    %cst_56 = arith.constant -1.280000e+02 : f32
    %cst_57 = arith.constant 1.270000e+02 : f32
    %170 = vector.broadcast %cst_56 : f32 to vector<8x256xf32>
    %171 = arith.maximumf %170, %169 : vector<8x256xf32>
    %172 = vector.broadcast %cst_57 : f32 to vector<8x256xf32>
    %173 = arith.minimumf %172, %171 : vector<8x256xf32>
    %cst_58 = arith.constant 6.250000e-02 : f32
    %174 = vector.broadcast %cst_58 : f32 to vector<8x256xf32>
    %175 = arith.mulf %173, %174 : vector<8x256xf32>
    %cst_59 = arith.constant 0.000000e+00 : f32
    %176 = vector.broadcast %cst_59 : f32 to vector<8x256xf32>
    %177 = arith.maximumf %175, %176 : vector<8x256xf32>
    %c0_60 = arith.constant 0 : index
    %c0_61 = arith.constant 0 : index
    %178 = vector.load %arg4[%c0_60, %c0_61] : memref<8x72xf32, #tpu.memory_space<vmem>>, vector<8x72xf32>
    %c17_i32_62 = arith.constant 17 : i32
    %179 = tpu.dynamic_rotate %177 by %c17_i32_62 dim 1 : vector<8x256xf32>, i32 -> vector<8x256xf32>
    %cst_63 = arith.constant 0.000000e+00 : f32
    %180 = vector.shape_cast %15 : vector<1x256xi1> to vector<1x256xi1>
    %181 = vector.broadcast %180 : vector<1x256xi1> to vector<8x256xi1>
    %182 = vector.broadcast %cst_63 : f32 to vector<8x256xf32>
    %183 = arith.select %181, %179, %182 : vector<8x256xi1>, vector<8x256xf32>
    %c16_i32_64 = arith.constant 16 : i32
    %184 = tpu.dynamic_rotate %177 by %c16_i32_64 dim 1 : vector<8x256xf32>, i32 -> vector<8x256xf32>
    %cst_65 = arith.constant 0.000000e+00 : f32
    %185 = vector.shape_cast %26 : vector<1x256xi1> to vector<1x256xi1>
    %186 = vector.broadcast %185 : vector<1x256xi1> to vector<8x256xi1>
    %187 = vector.broadcast %cst_65 : f32 to vector<8x256xf32>
    %188 = arith.select %186, %184, %187 : vector<8x256xi1>, vector<8x256xf32>
    %c15_i32_66 = arith.constant 15 : i32
    %189 = tpu.dynamic_rotate %177 by %c15_i32_66 dim 1 : vector<8x256xf32>, i32 -> vector<8x256xf32>
    %cst_67 = arith.constant 0.000000e+00 : f32
    %190 = vector.shape_cast %37 : vector<1x256xi1> to vector<1x256xi1>
    %191 = vector.broadcast %190 : vector<1x256xi1> to vector<8x256xi1>
    %192 = vector.broadcast %cst_67 : f32 to vector<8x256xf32>
    %193 = arith.select %191, %189, %192 : vector<8x256xi1>, vector<8x256xf32>
    %c1_i32_68 = arith.constant 1 : i32
    %194 = tpu.dynamic_rotate %177 by %c1_i32_68 dim 1 : vector<8x256xf32>, i32 -> vector<8x256xf32>
    %cst_69 = arith.constant 0.000000e+00 : f32
    %195 = vector.shape_cast %48 : vector<1x256xi1> to vector<1x256xi1>
    %196 = vector.broadcast %195 : vector<1x256xi1> to vector<8x256xi1>
    %197 = vector.broadcast %cst_69 : f32 to vector<8x256xf32>
    %198 = arith.select %196, %194, %197 : vector<8x256xi1>, vector<8x256xf32>
    %cst_70 = arith.constant 0.000000e+00 : f32
    %199 = vector.shape_cast %59 : vector<1x256xi1> to vector<1x256xi1>
    %200 = vector.broadcast %199 : vector<1x256xi1> to vector<8x256xi1>
    %201 = vector.broadcast %cst_70 : f32 to vector<8x256xf32>
    %202 = arith.select %200, %177, %201 : vector<8x256xi1>, vector<8x256xf32>
    %c255_i32_71 = arith.constant 255 : i32
    %203 = tpu.dynamic_rotate %177 by %c255_i32_71 dim 1 : vector<8x256xf32>, i32 -> vector<8x256xf32>
    %cst_72 = arith.constant 0.000000e+00 : f32
    %204 = vector.shape_cast %70 : vector<1x256xi1> to vector<1x256xi1>
    %205 = vector.broadcast %204 : vector<1x256xi1> to vector<8x256xi1>
    %206 = vector.broadcast %cst_72 : f32 to vector<8x256xf32>
    %207 = arith.select %205, %203, %206 : vector<8x256xi1>, vector<8x256xf32>
    %c241_i32_73 = arith.constant 241 : i32
    %208 = tpu.dynamic_rotate %177 by %c241_i32_73 dim 1 : vector<8x256xf32>, i32 -> vector<8x256xf32>
    %cst_74 = arith.constant 0.000000e+00 : f32
    %209 = vector.shape_cast %81 : vector<1x256xi1> to vector<1x256xi1>
    %210 = vector.broadcast %209 : vector<1x256xi1> to vector<8x256xi1>
    %211 = vector.broadcast %cst_74 : f32 to vector<8x256xf32>
    %212 = arith.select %210, %208, %211 : vector<8x256xi1>, vector<8x256xf32>
    %c240_i32_75 = arith.constant 240 : i32
    %213 = tpu.dynamic_rotate %177 by %c240_i32_75 dim 1 : vector<8x256xf32>, i32 -> vector<8x256xf32>
    %cst_76 = arith.constant 0.000000e+00 : f32
    %214 = vector.shape_cast %92 : vector<1x256xi1> to vector<1x256xi1>
    %215 = vector.broadcast %214 : vector<1x256xi1> to vector<8x256xi1>
    %216 = vector.broadcast %cst_76 : f32 to vector<8x256xf32>
    %217 = arith.select %215, %213, %216 : vector<8x256xi1>, vector<8x256xf32>
    %c239_i32_77 = arith.constant 239 : i32
    %218 = tpu.dynamic_rotate %177 by %c239_i32_77 dim 1 : vector<8x256xf32>, i32 -> vector<8x256xf32>
    %cst_78 = arith.constant 0.000000e+00 : f32
    %219 = vector.shape_cast %103 : vector<1x256xi1> to vector<1x256xi1>
    %220 = vector.broadcast %219 : vector<1x256xi1> to vector<8x256xi1>
    %221 = vector.broadcast %cst_78 : f32 to vector<8x256xf32>
    %222 = arith.select %220, %218, %221 : vector<8x256xi1>, vector<8x256xf32>
    %223 = tpu.concatenate %183, %188, %193, %198, %202, %207, %212, %217, %222 in 0 : vector<8x256xf32>, vector<8x256xf32>, vector<8x256xf32>, vector<8x256xf32>, vector<8x256xf32>, vector<8x256xf32>, vector<8x256xf32>, vector<8x256xf32>, vector<8x256xf32> -> vector<72x256xf32>
    %cst_79 = arith.constant dense<0.000000e+00> : vector<8x256xf32>
    %224 = tpu.matmul %178, %223, %cst_79 {dimension_numbers = #tpu.dot_dimension_numbers<[1], [0], [0], [1], [0, 0, 1, 1], [], []>} : vector<8x72xf32>, vector<72x256xf32>, vector<8x256xf32> -> vector<8x256xf32>
    %cst_80 = arith.constant 4.096000e+03 : f32
    %225 = vector.broadcast %cst_80 : f32 to vector<8x256xf32>
    %226 = arith.mulf %224, %225 : vector<8x256xf32>
    %227 = math.roundeven %226 : vector<8x256xf32>
    %cst_81 = arith.constant -3.276800e+04 : f32
    %cst_82 = arith.constant 3.276700e+04 : f32
    %228 = vector.broadcast %cst_81 : f32 to vector<8x256xf32>
    %229 = arith.maximumf %228, %227 : vector<8x256xf32>
    %230 = vector.broadcast %cst_82 : f32 to vector<8x256xf32>
    %231 = arith.minimumf %230, %229 : vector<8x256xf32>
    %cst_83 = arith.constant 2.44140625E-4 : f32
    %232 = vector.broadcast %cst_83 : f32 to vector<8x256xf32>
    %233 = arith.mulf %231, %232 : vector<8x256xf32>
    %234 = vector.broadcast %106 : vector<8x1xf32> to vector<8x256xf32>
    %235 = arith.addf %233, %234 : vector<8x256xf32>
    %cst_84 = arith.constant 1.600000e+01 : f32
    %236 = vector.broadcast %cst_84 : f32 to vector<8x256xf32>
    %237 = arith.mulf %235, %236 : vector<8x256xf32>
    %238 = math.roundeven %237 : vector<8x256xf32>
    %cst_85 = arith.constant -1.280000e+02 : f32
    %cst_86 = arith.constant 1.270000e+02 : f32
    %239 = vector.broadcast %cst_85 : f32 to vector<8x256xf32>
    %240 = arith.maximumf %239, %238 : vector<8x256xf32>
    %241 = vector.broadcast %cst_86 : f32 to vector<8x256xf32>
    %242 = arith.minimumf %241, %240 : vector<8x256xf32>
    %cst_87 = arith.constant 6.250000e-02 : f32
    %243 = vector.broadcast %cst_87 : f32 to vector<8x256xf32>
    %244 = arith.mulf %242, %243 : vector<8x256xf32>
    %245 = vector.broadcast %107 : vector<8x1xf32> to vector<8x256xf32>
    %246 = arith.mulf %244, %245 : vector<8x256xf32>
    %247 = vector.broadcast %108 : vector<8x1xf32> to vector<8x256xf32>
    %248 = arith.mulf %1, %247 : vector<8x256xf32>
    %249 = arith.addf %246, %248 : vector<8x256xf32>
    %cst_88 = arith.constant 1.600000e+01 : f32
    %250 = vector.broadcast %cst_88 : f32 to vector<8x256xf32>
    %251 = arith.mulf %249, %250 : vector<8x256xf32>
    %252 = math.roundeven %251 : vector<8x256xf32>
    %cst_89 = arith.constant -1.280000e+02 : f32
    %cst_90 = arith.constant 1.270000e+02 : f32
    %253 = vector.broadcast %cst_89 : f32 to vector<8x256xf32>
    %254 = arith.maximumf %253, %252 : vector<8x256xf32>
    %255 = vector.broadcast %cst_90 : f32 to vector<8x256xf32>
    %256 = arith.minimumf %255, %254 : vector<8x256xf32>
    %cst_91 = arith.constant 6.250000e-02 : f32
    %257 = vector.broadcast %cst_91 : f32 to vector<8x256xf32>
    %258 = arith.mulf %256, %257 : vector<8x256xf32>
    %cst_92 = arith.constant 0.000000e+00 : f32
    %259 = vector.broadcast %cst_92 : f32 to vector<8x256xf32>
    %260 = arith.maximumf %258, %259 : vector<8x256xf32>
    %c0_93 = arith.constant 0 : index
    %c0_94 = arith.constant 0 : index
    %c0_95 = arith.constant 0 : index
    %261 = vector.load %arg6[%c0_93, %c0_94, %c0_95] : memref<1x8x256xf32, #tpu.memory_space<vmem>>, vector<1x8x256xf32>
    %262 = vector.shape_cast %261 : vector<1x8x256xf32> to vector<8x256xf32>
    %263 = vector.shape_cast %260 : vector<8x256xf32> to vector<1x8x256xf32>
    tpu.vector_store %arg6[%c0_93, %c0_94, %c0_95], %263 {strides = array<i32>} : memref<1x8x256xf32, #tpu.memory_space<vmem>>, vector<1x8x256xf32>,
    return
  }
  func.func @transform_0(%arg0: i32) -> (i32, i32, i32) {
    %c0_i32 = arith.constant 0 : i32
    %c0_i32_0 = arith.constant 0 : i32
    %c0_i32_1 = arith.constant 0 : i32
    return %arg0, %c0_i32, %c0_i32_0 : i32, i32, i32
  }
  func.func @transform_1(%arg0: i32) -> (i32, i32) {
    %c0_i32 = arith.constant 0 : i32
    %c0_i32_0 = arith.constant 0 : i32
    %c0_i32_1 = arith.constant 0 : i32
    return %c0_i32, %c0_i32_0 : i32, i32
  }
  func.func @transform_2(%arg0: i32) -> (i32, i32) {
    %c0_i32 = arith.constant 0 : i32
    %c0_i32_0 = arith.constant 0 : i32
    %c0_i32_1 = arith.constant 0 : i32
    return %c0_i32, %c0_i32_0 : i32, i32
  }
  func.func @transform_3(%arg0: i32) -> (i32, i32) {
    %c0_i32 = arith.constant 0 : i32
    %c0_i32_0 = arith.constant 0 : i32
    %c0_i32_1 = arith.constant 0 : i32
    return %c0_i32, %c0_i32_0 : i32, i32
  }
  func.func @transform_4(%arg0: i32) -> (i32, i32) {
    %c0_i32 = arith.constant 0 : i32
    %c0_i32_0 = arith.constant 0 : i32
    %c0_i32_1 = arith.constant 0 : i32
    return %c0_i32, %c0_i32_0 : i32, i32
  }
  func.func @transform_5(%arg0: i32) -> (i32, i32, i32) {
    %c0_i32 = arith.constant 0 : i32
    %c0_i32_0 = arith.constant 0 : i32
    %c0_i32_1 = arith.constant 0 : i32
    return %arg0, %c0_i32, %c0_i32_0 : i32, i32, i32
  }
}

</mosaic_0001>

<bundles_post_ra>
// kernel: basic_block.1
= control target key start
LH: loop header
LB: loop body
LE: loop exit
PB: predicated region body
PF: predicated region fallthrough
CT: control target
= control target key end

     0   :  { %s1096_s18 = smov 0   ;;  %s1569_s0 = inlined_call_operand.vmem [shape: f32[2,8,256], index: 0, kind: input, shape index: {}]   ;;  %s1570_s1 = inlined_call_operand.vmem [shape: s32[2,256], index: 1, kind: input, shape index: {}]   ;;  %s1571_s2 = inlined_call_operand.vmem [shape: f32[8,72], index: 2, kind: input, shape index: {}]   ;;  %s1572_s3 = inlined_call_operand.vmem [shape: f32[8,72], index: 3, kind: input, shape index: {}]   ;;  %s1573_s4 = inlined_call_operand.vmem [shape: f32[8,4], index: 4, kind: input, shape index: {}]   ;;  %s1574_s5 = inlined_call_operand.vmem [shape: f32[2,8,256], index: 5, kind: output, shape index: {}]  }
   0x1 LB: > { %s882_s19 = sadd.s32 4294967295, %s1051_s18   ;;  %p886_p0 = scmp.ge.s32.totalorder %s1051_s18, 1  ;;  %s1051_s18 = sphi %s1096_s18, %s15_s18  }
   0x2   : > { %p187_p1 = scmp.lt.s32.totalorder %s1051_s18, 3 }
   0x4   : > { %p188_p2 = pnand %p886_p0, %p187_p1 }
   0x5   : > { %p215_p3 = scmp.lt.s32.totalorder (!%p188_p2), %s882_s19, 1  ;;  %s1054_s24 = smov (!%p188_p2), 112  }
   0x6   : > { %191 = sbr.rel (%p188_p2) target bundleno = 797 (0x31d), region = 40  ;;  %s1055_s25 = smov (!%p188_p2), 111  }
   0x7   : > { %s1056_s26 = smov (!%p188_p2), 113   ;;  %s1057_s27 = smov (!%p188_p2), 127  }
   0x8   : > { %s1058_s28 = smov (!%p188_p2), 1   ;;  %s1060_s29 = smov (!%p188_p2), 15  }
   0x9   : > { %s1061_s30 = smov (!%p188_p2), 16   ;;  %s1062_s6 = smov (!%p188_p2), 17  }
   0xb   : > { %v1053_v0 = vmov 0   ;;  %s1627_s19 = smov (!%p215_p3, %s882_s19), 1  ;;  %v1059_v3 = vmov 0.0   ;;  %v1152_v4 = vld [vmem:[%s1573_s4] sm:$0xff]  ;;  %v285_v14 = vlaneseq }
   0xc   : > { %1040 = vset.pattern.permute.xlu0 %v1053_v0  ;;  %s937_s20 = sshll.u32 %s1627_s19, 4  ;;  %596 = vmatprep.mubr.f32.mxu0 %v1059_v3  ;;  %v227_v5 = vld [vmem:[%s1570_s1] sm:$0xf] }
   0xd   : > { %s219_s23 = scalar_lea.vmem %s1569_s0, %s937_s20  ;;  %766 = vmatprep.mubr.f32.mxu1 %v1059_v3  ;;  %vm253_vm0 = vcmp.ge.s32.totalorder %v227_v5, 4294967295  ;;  %vm241_vm1 = vcmp.ge.s32.totalorder %v227_v5, 0  ;;  %vm259_vm2 = vcmp.lt.s32.totalorder %v227_v5, 15  ;;  %vm228_vm3 = vcmp.ge.s32.totalorder %v227_v5, 1  ;;  %s224_s17 = scalar_lea.vmem %s1574_s5, %s937_s20 }
   0xe   : > { %v1113_v1 = vld [vmem:[%s219_s23] sm:$0xff]  ;;  %v1119_v2 = vld [vmem:[%s219_s23 + $0x8] sm:$0xff]  ;;  %v254_v6 = vsel %vm253_vm0, 1, %v1053_v0  ;;  %v242_v7 = vsel %vm241_vm1, 1, %v1053_v0  ;;  %vm247_vm4 = vcmp.lt.s32.totalorder %v227_v5, 16  ;;  %v260_v9 = vsel %vm259_vm2, 1, %v1053_v0  ;;  %vm1172_vm7 = vmand %vm253_vm0, %vm259_vm2 }
   0xf   : > { %472 = vrot.lane.b32.xlu1 %v1113_v1, %s1054_s24  ;;  %500 = vrot.lane.b32.xlu0 %v1113_v1, %s1055_s25  ;;  %v895_v8 = vrot.slane %v254_v6, 9  ;;  %vm229_vm5 = vcmp.lt.s32.totalorder %v227_v5, 17  ;;  %v231_v10 = vsel %vm228_vm3, 1, %v1053_v0  ;;  %v893_v11 = vrot.slane %v242_v7, 9  ;;  %vm1196_vm12 = vmand %vm241_vm1, %vm247_vm4 }
  0x10   : > { %v248_v12 = vsel %vm247_vm4, 1, %v1053_v0  ;;  %v896_v13 = vrot.slane %v260_v9, 9  ;;  %v891_v17 = vrot.slane %v231_v10, 9  ;;  %v236_v18 = vsel %vm229_vm5, 1, %v1053_v0 }
  0x11   : > { %vm1167_vm6 = vcmp.ne.s32.totalorder %v895_v8, 0  ;;  %v894_v19 = vrot.slane %v248_v12, 9  ;;  %vm1178_vm8 = vcmp.ne.s32.totalorder %v893_v11, 0  ;;  %v892_v22 = vrot.slane %v236_v18, 9 }
  0x12   : > { %vm1182_vm9 = vcmp.ne.s32.totalorder %v896_v13, 0  ;;  %vm277_vm10 = vmand %vm1172_vm7, %vm1167_vm6  ;;  %v292_v23 = vshrl.u32 %v285_v14, 7  ;;  %vm1190_vm11 = vcmp.ne.s32.totalorder %v891_v17, 0  ;;  %v1248_v37 = vand.u32 127, %v285_v14 }
  0x13   : > { %474 = vrot.lane.b32.xlu1 %v1119_v2, %s1054_s24  ;;  %502 = vrot.lane.b32.xlu0 %v1119_v2, %s1055_s25  ;;  %vm1200_vm13 = vcmp.ne.s32.totalorder %v894_v19, 0  ;;  %vm275_vm14 = vmand %vm1172_vm7, %vm1178_vm8  ;;  %vm1210_vm0 = vcmp.ne.s32.totalorder %v892_v22, 0 }
  0x14   : > { %vm278_vm15 = vmand %vm277_vm10, %vm1182_vm9  ;;  %v1218_v28 = vsub.s32 2, %v292_v23  ;;  %v1222_v29 = vsub.s32 0, %v292_v23 }
  0x15   : > { %vm273_vm1 = vmand %vm1172_vm7, %vm1190_vm11  ;;  %v507_v30 = vsel %vm278_vm15, 1, %v1053_v0 }
  0x16   : > { %vm276_vm2 = vmand %vm275_vm14, %vm1200_vm13  ;;  %v515_v32 = vrot.slane %v507_v30, %v1218_v28  ;;  %v511_v33 = vrot.slane %v507_v30, %v1222_v29 }
  0x17   : > { %446 = vrot.lane.b32.xlu1 %v1119_v2, %s1056_s26  ;;  %444 = vrot.lane.b32.xlu0 %v1113_v1, %s1056_s26  ;;  %vm270_vm4 = vmand %vm1196_vm12, %vm1167_vm6  ;;  %v479_v31 = vsel %vm276_vm2, 1, %v1053_v0 }
  0x18   : > { %vm274_vm10 = vmand %vm273_vm1, %vm1210_vm0  ;;  %v487_v35 = vrot.slane %v479_v31, %v1218_v28  ;;  %v483_v38 = vrot.slane %v479_v31, %v1222_v29  ;;  %v1256_v39 = vrot.slane %v515_v32, %v1222_v29  ;;  %v1267_v45 = vrot.slane %v511_v33, %v1222_v29 }
  0x19   : > { %vm268_vm7 = vmand %vm1196_vm12, %vm1178_vm8  ;;  %v451_v34 = vsel %vm274_vm10, 1, %v1053_v0  ;;  %vm476_vm10 = vcmp.lt.s32.totalorder %v1248_v37, 112 }
  0x1a   : > { %vm271_vm14 = vmand %vm270_vm4, %vm1182_vm9  ;;  %v459_v40 = vrot.slane %v451_v34, %v1218_v28  ;;  %v455_v46 = vrot.slane %v451_v34, %v1222_v29  ;;  %v1271_v47 = vrot.slane %v487_v35, %v1222_v29  ;;  %vm504_vm4 = vcmp.lt.s32.totalorder %v1248_v37, 111 }
  0x1b   : > { %418 = vrot.lane.b32.xlu1 %v1119_v2, %s1057_s27  ;;  %416 = vrot.lane.b32.xlu0 %v1113_v1, %s1057_s27  ;;  %vm1244_vm15 = vmand %vm268_vm7, %vm1200_vm13  ;;  %v423_v41 = vsel %vm271_vm14, 1, %v1053_v0  ;;  %v1277_v48 = vrot.slane %v483_v38, %v1222_v29  ;;  %vm524_vm7 = vcmp.eq.s32.totalorder %v1267_v45, 1 }
  0x1c   : > { %vm266_vm1 = vmand %vm1196_vm12, %vm1190_vm11  ;;  %v431_v49 = vrot.slane %v423_v41, %v1218_v28  ;;  %v395_v50 = vsel %vm1244_vm15, 1, %v1053_v0  ;;  %v1289_v51 = vrot.slane %v459_v40, %v1222_v29  ;;  %v427_v52 = vrot.slane %v423_v41, %v1222_v29 }
  0x1d   : > { %vm1262_vm2 = vmand %vm228_vm3, %vm229_vm5  ;;  %vm525_vm5 = vcmp.eq.s32.totalorder %v1256_v39, 1  ;;  %v1295_v55 = vrot.slane %v455_v46, %v1222_v29  ;;  %v403_v59 = vrot.slane %v395_v50, %v1218_v28  ;;  %vm1576_vm15 = vcmp.lt.s32.totalorder %v1248_v37, 113 }
  0x1e   : > { %vm267_vm12 = vmand %vm266_vm1, %vm1210_vm0  ;;  %vm1577_vm1 = vcmp.eq.s32.totalorder %v1277_v48, 1  ;;  %v1315_v61 = vrot.slane %v431_v49, %v1222_v29  ;;  %v399_v62 = vrot.slane %v395_v50, %v1222_v29  ;;  %v1328_v3 = vrot.slane %v427_v52, %v1222_v29 }
  0x1f   : > { %369 = vrot.lane.b32.xlu1 %v1119_v2, %s1058_s28  ;;  %367 = vrot.lane.b32.xlu0 %v1113_v1, %s1058_s28  ;;  %vm258_vm3 = vmand %vm1262_vm2, %vm1167_vm6  ;;  %v374_v56 = vsel %vm267_vm12, 1, %v1053_v0  ;;  %vm1575_vm6 = vcmp.eq.s32.totalorder %v1271_v47, 1  ;;  %vm469_vm12 = vcmp.eq.s32.totalorder %v1289_v51, 1  ;;  %v1347_v13 = vrot.slane %v403_v59, %v1222_v29 }
  0x20   : > { %vm1306_vm14 = vmand %vm258_vm3, %vm1182_vm9  ;;  %v382_v5 = vrot.slane %v374_v56, %v1218_v28  ;;  %vm468_vm3 = vcmp.eq.s32.totalorder %v1295_v55, 1  ;;  %v378_v9 = vrot.slane %v374_v56, %v1222_v29  ;;  %v1360_v14 = vrot.slane %v399_v62, %v1222_v29 }
  0x21   : > { %vm246_vm9 = vmand %vm1262_vm2, %vm1178_vm8  ;;  %v346_v10 = vsel %vm1306_vm14, 1, %v1053_v0  ;;  %vm440_vm8 = vcmp.eq.s32.totalorder %v1328_v3, 1 }
  0x22   : > { %vm252_vm14 = vmand %vm246_vm9, %vm1200_vm13  ;;  %v1370_v15 = vrot.slane %v382_v5, %v1222_v29  ;;  %v354_v16 = vrot.slane %v346_v10, %v1218_v28  ;;  %v1375_v19 = vrot.slane %v378_v9, %v1222_v29  ;;  %v350_v20 = vrot.slane %v346_v10, %v1222_v29 }
  0x23   : > { %341 = vrot.lane.b32.xlu1 %v1119_v2, %s1060_s29  ;;  %339 = vrot.lane.b32.xlu0 %v1113_v1, %s1060_s29  ;;  %v318_v21 = vsel %vm252_vm14, 1, %v1053_v0  ;;  %vm1581_vm9 = vcmp.eq.s32.totalorder %v1360_v14, 1 }
  0x24   : > { %vm1580_vm14 = vcmp.eq.s32.totalorder %v1370_v15, 1  ;;  %v1394_v24 = vrot.slane %v354_v16, %v1222_v29  ;;  %v326_v25 = vrot.slane %v318_v21, %v1218_v28  ;;  %v1402_v30 = vrot.slane %v350_v20, %v1222_v29 }
  0x25   : > { %v322_v31 = vrot.slane %v318_v21, %v1222_v29 }
  0x27   : > { %313 = vrot.lane.b32.xlu1 %v1119_v2, %s1061_s30  ;;  %311 = vrot.lane.b32.xlu0 %v1113_v1, %s1061_s30  ;;  %v1425_v40 = vrot.slane %v322_v31, %v1222_v29 }
  0x2b   : > { %283 = vrot.lane.b32.xlu1 %v1119_v2, %s1062_s6  ;;  %281 = vrot.lane.b32.xlu0 %v1113_v1, %s1062_s6 }
  0x2f   : > { %615 = vperm.xlu0 %1040, %v1152_v4  }
  0x81   : > { %v473_v43 = vpop.permute.xlu1 %472  ;;  %v501_v44 = vpop.permute.xlu0 %500 }
  0x85   : > { %v475_v53 = vpop.permute.xlu1 %474  ;;  %v503_v54 = vpop.permute.xlu0 %502 }
  0x86   : > { %v506_v57 = vsel %vm504_vm4, %v503_v54, %v501_v44  ;;  %v505_v58 = vsel %vm504_vm4, %v501_v44, %v503_v54  ;;  %v478_v63 = vsel %vm476_vm10, %v475_v53, %v473_v43  ;;  %v477_v6 = vsel %vm476_vm10, %v473_v43, %v475_v53 }
  0x87   : > { %897 = vmatprep.subr.msk.mxu0 %vm525_vm5, %v506_v57  ;;  %v280_v57 = vld [vmem:[%s1571_s2] sm:$0xff] }
  0x88   : > { %898 = vmatpush1.msk.msra.mxu0 %vm524_vm7, %v505_v58 }
  0x89   : > { %v447_v7 = vpop.permute.xlu1 %446  ;;  %899 = vmatprep.subr.msk.mxu0 %vm1575_vm6, %v478_v63  ;;  %v445_v8 = vpop.permute.xlu0 %444  ;;  %vm420_vm6 = vcmp.lt.s32.totalorder %v1248_v37, 127 }
  0x8a   : > { %v449_v11 = vsel %vm1576_vm15, %v445_v8, %v447_v7  ;;  %v450_v12 = vsel %vm1576_vm15, %v447_v7, %v445_v8  ;;  %900 = vmatpush1.msk.msra.mxu0 %vm1577_vm1, %v477_v6  ;;  %vm235_vm15 = vmand %vm1262_vm2, %vm1190_vm11  ;;  %vm441_vm1 = vcmp.eq.s32.totalorder %v1315_v61, 1  ;;  %vm413_vm11 = vcmp.eq.s32.totalorder %v1347_v13, 1 }
  0x8b   : > { %901 = vmatprep.subr.msk.mxu0 %vm469_vm12, %v450_v12  ;;  %vm240_vm13 = vmand %vm235_vm15, %vm1210_vm0  ;;  %vm1578_vm2 = vcmp.lt.s32.totalorder %v1248_v37, 1  ;;  %vm1579_vm0 = vcmp.eq.s32.totalorder %v1375_v19, 1  ;;  %vm1584_vm15 = vcmp.lt.s32.totalorder %v1248_v37, 15 }
  0x8c   : > { %902 = vmatpush1.msk.msra.mxu0 %vm468_vm3, %v449_v11  ;;  %v290_v32 = vsel %vm240_vm13, 1, %v1053_v0  ;;  %vm1583_vm13 = vcmp.eq.s32.totalorder %v1394_v24, 1  ;;  %v1420_v0 = vrot.slane %v326_v25, %v1222_v29 }
  0x8d   : > { %v419_v17 = vpop.permute.xlu1 %418  ;;  %v417_v18 = vpop.permute.xlu0 %416  ;;  %v298_v35 = vrot.slane %v290_v32, %v1218_v28  ;;  %v294_v41 = vrot.slane %v290_v32, %v1222_v29 }
  0x8e   : > { %v421_v22 = vsel %vm420_vm6, %v417_v18, %v419_v17  ;;  %v422_v23 = vsel %vm420_vm6, %v419_v17, %v417_v18 }
  0x8f   : > { %903 = vmatprep.subr.msk.mxu0 %vm441_vm1, %v422_v23  ;;  %v1439_v28 = vrot.slane %v298_v35, %v1222_v29  ;;  %v1443_v49 = vrot.slane %v294_v41, %v1222_v29 }
  0x90   : > { %904 = vmatpush1.msk.msra.mxu0 %vm440_vm8, %v421_v22 }
  0x91   : > { %v370_v26 = vpop.permute.xlu1 %369  ;;  %905 = vmatprep.subr.msk.mxu0 %vm413_vm11, %v1119_v2  ;;  %v368_v27 = vpop.permute.xlu0 %367 }
  0x92   : > { %v372_v33 = vsel %vm1578_vm2, %v368_v27, %v370_v26  ;;  %v373_v34 = vsel %vm1578_vm2, %v370_v26, %v368_v27  ;;  %906 = vmatpush1.msk.msra.mxu0 %vm1581_vm9, %v1113_v1  ;;  %vm1582_vm2 = vcmp.eq.s32.totalorder %v1402_v30, 1  ;;  %vm335_vm9 = vcmp.eq.s32.totalorder %v1425_v40, 1 }
  0x93   : > { %907 = vmatprep.subr.msk.mxu0 %vm1580_vm14, %v372_v33  ;;  %vm1585_vm14 = vcmp.eq.s32.totalorder %v1420_v0, 1 }
  0x94   : > { %908 = vmatpush1.msk.msra.mxu0 %vm1579_vm0, %v373_v34  ;;  %vm315_vm0 = vcmp.lt.s32.totalorder %v1248_v37, 16 }
  0x95   : > { %v342_v36 = vpop.permute.xlu1 %341  ;;  %v340_v38 = vpop.permute.xlu0 %339 }
  0x96   : > { %v344_v42 = vsel %vm1584_vm15, %v340_v38, %v342_v36  ;;  %v345_v43 = vsel %vm1584_vm15, %v342_v36, %v340_v38  ;;  %vm1587_vm15 = vcmp.eq.s32.totalorder %v1443_v49, 1 }
  0x97   : > { %909 = vmatprep.subr.msk.mxu0 %vm1583_vm13, %v344_v42  ;;  %vm1586_vm13 = vcmp.eq.s32.totalorder %v1439_v28, 1 }
  0x98   : > { %910 = vmatpush1.msk.msra.mxu0 %vm1582_vm2, %v345_v43  ;;  %vm287_vm2 = vcmp.lt.s32.totalorder %v1248_v37, 17 }
  0x99   : > { %v314_v44 = vpop.permute.xlu1 %313  ;;  %v312_v46 = vpop.permute.xlu0 %311 }
  0x9a   : > { %v316_v50 = vsel %vm315_vm0, %v312_v46, %v314_v44  ;;  %v317_v52 = vsel %vm315_vm0, %v314_v44, %v312_v46 }
  0x9b   : > { %911 = vmatprep.subr.msk.mxu0 %vm1585_vm14, %v316_v50  ;;  %vm528_vm14 = vcmask 588800  }
  0x9c   : > { %912 = vmatpush1.msk.msra.mxu0 %vm335_vm9, %v317_v52 }
  0x9d   : > { %v284_v53 = vpop.permute.xlu1 %283  ;;  %v282_v54 = vpop.permute.xlu0 %281 }
  0x9e   : > { %v288_v29 = vsel %vm287_vm2, %v282_v54, %v284_v53  ;;  %v289_v56 = vsel %vm287_vm2, %v284_v53, %v282_v54 }
  0x9f   : > { %913 = vmatprep.subr.msk.mxu0 %vm1586_vm13, %v288_v29 }
  0xa0   : > { %914 = vmatpush1.msk.msra.mxu0 %vm1587_vm15, %v289_v56 }
  0xa1   : > { %915 = vmatmul.mubr.msk.f32.vlgmr.msra.gmra.mxu0 %vm528_vm14, %v280_v57 }
  0xaa   : > { %v616_v26 = vpop.permute.xlu0 %615 }
 0x161   : > { %v598_v58 = vpop.f32.mrf.mxu0 }
 0x162   : > { %v603_v59 = vmul.f32 4096.0, %v598_v58 }
 0x163   : > { %v600_v60 = vpop.f32.mrf.mxu0 }
 0x164   : > { %v941_v62 = vcvt.f32.s32 %v603_v59  ;;  %v604_v63 = vmul.f32 4096.0, %v600_v60  ;;  %v939_v7 = vand.u32 2147483647, %v603_v59  ;;  %v944_v9 = vand.u32 2147483648, %v603_v59 }
 0x166   : > { %v942_v5 = vcvt.s32.f32 %v941_v62  ;;  %v949_v6 = vcvt.f32.s32 %v604_v63  ;;  %v947_v11 = vand.u32 2147483647, %v604_v63  ;;  %v952_v16 = vand.u32 2147483648, %v604_v63 }
 0x167   : > { %vm940_vm13 = vcmp.lt.f32.partialorder %v939_v7, 8388608.0 }
 0x168   : > { %v943_v8 = vand.u32 2147483647, %v942_v5  ;;  %v950_v10 = vcvt.s32.f32 %v949_v6  ;;  %vm948_vm15 = vcmp.lt.f32.partialorder %v947_v11, 8388608.0  ;;  %v1065_v11 = vmov 3  }
 0x16a   : > { %v951_v12 = vand.u32 2147483647, %v950_v10  ;;  %v945_v17 = vor.u32 %v944_v9, %v943_v8  ;;  %v1063_v9 = vmov 1   ;;  %v1064_v10 = vmov 2  }
 0x16b   : > { %1041 = vset.pattern.permute.xlu0 %v1063_v9  ;;  %1042 = vset.pattern.permute.xlu1 %v1064_v10 }
 0x16c   : > { %v946_v18 = vsel %vm940_vm13, %v945_v17, %v603_v59  ;;  %v953_v20 = vor.u32 %v952_v16, %v951_v12 }
 0x16d   : > { %v607_v21 = vmax.f32 %v946_v18, -32768.0 }
 0x16e   : > { %v954_v22 = vsel %vm948_vm15, %v953_v20, %v604_v63 }
 0x16f   : > { %v608_v23 = vmax.f32 %v954_v22, -32768.0  ;;  %v609_v25 = vmin.f32 %v607_v21, 32767.0 }
 0x171   : > { %v610_v27 = vmin.f32 %v608_v23, 32767.0  ;;  %v611_v31 = vmul.f32 0.00024414063, %v609_v25 }
 0x173   : > { %v612_v32 = vmul.f32 0.00024414063, %v610_v27  ;;  %v618_v33 = vadd.f32 %v616_v26, %v611_v31 }
 0x175   : > { %v619_v34 = vadd.f32 %v616_v26, %v612_v32  ;;  %v620_v35 = vmul.f32 16.0, %v618_v33 }
 0x177   : > { %v621_v36 = vmul.f32 16.0, %v619_v34  ;;  %v957_v38 = vcvt.f32.s32 %v620_v35  ;;  %v955_v43 = vand.u32 2147483647, %v620_v35  ;;  %v960_v46 = vand.u32 2147483648, %v620_v35 }
 0x179   : > { %v958_v41 = vcvt.s32.f32 %v957_v38  ;;  %v965_v42 = vcvt.f32.s32 %v621_v36  ;;  %v963_v52 = vand.u32 2147483647, %v621_v36  ;;  %v968_v29 = vand.u32 2147483648, %v621_v36  ;;  %v632_v38 = vld [vmem:[%s1572_s3] sm:$0xff] }
 0x17a   : > { %vm956_vm15 = vcmp.lt.f32.partialorder %v955_v43, 8388608.0 }
 0x17b   : > { %v959_v44 = vand.u32 2147483647, %v958_v41  ;;  %v966_v50 = vcvt.s32.f32 %v965_v42  ;;  %vm964_vm13 = vcmp.lt.f32.partialorder %v963_v52, 8388608.0 }
 0x17d   : > { %v961_v53 = vor.u32 %v960_v46, %v959_v44  ;;  %v967_v54 = vand.u32 2147483647, %v966_v50 }
 0x17f   : > { %v962_v56 = vsel %vm956_vm15, %v961_v53, %v620_v35  ;;  %v969_v57 = vor.u32 %v968_v29, %v967_v54  ;;  %vm1610_vm15 = vcmp.eq.s32.totalorder %v1271_v47, 1 }
 0x180   : > { %v624_v58 = vmax.f32 %v962_v56, -128.0 }
 0x181   : > { %v970_v59 = vsel %vm964_vm13, %v969_v57, %v621_v36  ;;  %vm1611_vm13 = vcmp.eq.s32.totalorder %v1277_v48, 1 }
 0x182   : > { %v625_v60 = vmax.f32 %v970_v59, -128.0  ;;  %v626_v62 = vmin.f32 %v624_v58, 127.0 }
 0x184   : > { %v627_v63 = vmin.f32 %v625_v60, 127.0  ;;  %v628_v5 = vmul.f32 0.0625, %v626_v62 }
 0x186   : > { %v629_v6 = vmul.f32 0.0625, %v627_v63  ;;  %v630_v7 = vmax.f32 %v628_v5, 0.0 }
 0x188   : > { %683 = vrot.lane.b32.xlu0 %v630_v7, %s1054_s24  ;;  %691 = vrot.lane.b32.xlu1 %v630_v7, %s1055_s25  ;;  %v631_v8 = vmax.f32 %v629_v6, 0.0 }
 0x18c   : > { %675 = vrot.lane.b32.xlu0 %v630_v7, %s1056_s26  ;;  %693 = vrot.lane.b32.xlu1 %v631_v8, %s1055_s25 }
 0x190   : > { %667 = vrot.lane.b32.xlu0 %v630_v7, %s1057_s27  ;;  %685 = vrot.lane.b32.xlu1 %v631_v8, %s1054_s24 }
 0x194   : > { %657 = vrot.lane.b32.xlu0 %v630_v7, %s1058_s28  ;;  %677 = vrot.lane.b32.xlu1 %v631_v8, %s1056_s26 }
 0x198   : > { %649 = vrot.lane.b32.xlu0 %v630_v7, %s1060_s29  ;;  %669 = vrot.lane.b32.xlu1 %v631_v8, %s1057_s27 }
 0x19c   : > { %641 = vrot.lane.b32.xlu0 %v630_v7, %s1061_s30  ;;  %659 = vrot.lane.b32.xlu1 %v631_v8, %s1058_s28 }
 0x1a0   : > { %633 = vrot.lane.b32.xlu0 %v630_v7, %s1062_s6  ;;  %651 = vrot.lane.b32.xlu1 %v631_v8, %s1060_s29 }
 0x1a4   : > { %643 = vrot.lane.b32.xlu1 %v631_v8, %s1061_s30  ;;  %784 = vperm.xlu0 %1041, %v1152_v4  }
 0x1a8   : > { %635 = vrot.lane.b32.xlu1 %v631_v8, %s1062_s6  ;;  %1044 = vset.pattern.permute.xlu0 %v1065_v11 }
 0x1ac   : > { %800 = vperm.xlu1 %1042, %v1152_v4  }
 0x1b0   : > { %1043 = vset.pattern.permute.xlu1 %v1065_v11 }
 0x1b1   : > { %806 = vperm.xlu1 %1043, %v1152_v4  }
 0x1fa   : > { %v684_v12 = vpop.permute.xlu0 %683  ;;  %v692_v16 = vpop.permute.xlu1 %691 }
 0x1fe   : > { %v676_v17 = vpop.permute.xlu0 %675  ;;  %v694_v18 = vpop.permute.xlu1 %693 }
 0x1ff   : > { %v696_v20 = vsel %vm504_vm4, %v694_v18, %v692_v16  ;;  %v695_v21 = vsel %vm504_vm4, %v692_v16, %v694_v18  ;;  %vm1612_vm4 = vcmp.lt.s32.totalorder %v1248_v37, 113 }
 0x200   : > { %916 = vmatprep.subr.msk.mxu1 %vm525_vm5, %v696_v20  ;;  %vm1613_vm5 = vmmov %vm1612_vm4 }
 0x201   : > { %917 = vmatpush1.msk.msra.mxu1 %vm524_vm7, %v695_v21 }
 0x202   : > { %v668_v22 = vpop.permute.xlu0 %667  ;;  %v686_v23 = vpop.permute.xlu1 %685 }
 0x203   : > { %v687_v4 = vsel %vm476_vm10, %v684_v12, %v686_v23  ;;  %v688_v25 = vsel %vm476_vm10, %v686_v23, %v684_v12  ;;  %vm1614_vm10 = vcmp.lt.s32.totalorder %v1248_v37, 1 }
 0x204   : > { %918 = vmatprep.subr.msk.mxu1 %vm1610_vm15, %v688_v25  ;;  %vm1615_vm7 = vmmov %vm1614_vm10  ;;  %vm1622_vm15 = vcmp.eq.s32.totalorder %v1402_v30, 1 }
 0x205   : > { %919 = vmatpush1.msk.msra.mxu1 %vm1611_vm13, %v687_v4  ;;  %vm1623_vm13 = vcmp.eq.s32.totalorder %v1420_v0, 1 }
 0x206   : > { %v678_v26 = vpop.permute.xlu1 %677  ;;  %v658_v27 = vpop.permute.xlu0 %657 }
 0x207   : > { %v679_v39 = vsel %vm1612_vm4, %v676_v17, %v678_v26  ;;  %v680_v45 = vsel %vm1613_vm5, %v678_v26, %v676_v17  ;;  %vm1625_vm4 = vcmp.eq.s32.totalorder %v1443_v49, 1 }
 0x208   : > { %920 = vmatprep.subr.msk.mxu1 %vm469_vm12, %v680_v45  ;;  %vm1616_vm12 = vcmp.eq.s32.totalorder %v1360_v14, 1 }
 0x209   : > { %921 = vmatpush1.msk.msra.mxu1 %vm468_vm3, %v679_v39  ;;  %vm1619_vm3 = vcmp.lt.s32.totalorder %v1248_v37, 15 }
 0x20a   : > { %v670_v31 = vpop.permute.xlu1 %669  ;;  %v650_v32 = vpop.permute.xlu0 %649 }
 0x20b   : > { %v671_v47 = vsel %vm420_vm6, %v668_v22, %v670_v31  ;;  %v672_v48 = vsel %vm420_vm6, %v670_v31, %v668_v22  ;;  %vm1617_vm6 = vcmp.eq.s32.totalorder %v1370_v15, 1 }
 0x20c   : > { %922 = vmatprep.subr.msk.mxu1 %vm441_vm1, %v672_v48  ;;  %vm1618_vm1 = vcmp.eq.s32.totalorder %v1375_v19, 1 }
 0x20d   : > { %923 = vmatpush1.msk.msra.mxu1 %vm440_vm8, %v671_v47  ;;  %vm1620_vm8 = vmmov %vm1619_vm3 }
 0x20e   : > { %924 = vmatprep.subr.msk.mxu1 %vm413_vm11, %v631_v8  ;;  %v660_v51 = vpop.permute.xlu1 %659  ;;  %v642_v34 = vpop.permute.xlu0 %641  ;;  %vm1621_vm11 = vcmp.eq.s32.totalorder %v1394_v24, 1 }
 0x20f   : > { %v661_v55 = vsel %vm1614_vm10, %v658_v27, %v660_v51  ;;  %v662_v33 = vsel %vm1615_vm7, %v660_v51, %v658_v27  ;;  %925 = vmatpush1.msk.msra.mxu1 %vm1616_vm12, %v630_v7 }
 0x210   : > { %926 = vmatprep.subr.msk.mxu1 %vm1617_vm6, %v661_v55 }
 0x211   : > { %927 = vmatpush1.msk.msra.mxu1 %vm1618_vm1, %v662_v33 }
 0x212   : > { %v652_v61 = vpop.permute.xlu1 %651  ;;  %v634_v35 = vpop.permute.xlu0 %633 }
 0x213   : > { %v653_v3 = vsel %vm1619_vm3, %v650_v32, %v652_v61  ;;  %v654_v13 = vsel %vm1620_vm8, %v652_v61, %v650_v32 }
 0x214   : > { %928 = vmatprep.subr.msk.mxu1 %vm1621_vm11, %v653_v3 }
 0x215   : > { %929 = vmatpush1.msk.msra.mxu1 %vm1622_vm15, %v654_v13 }
 0x216   : > { %v644_v14 = vpop.permute.xlu1 %643 }
 0x217   : > { %v645_v15 = vsel %vm315_vm0, %v642_v34, %v644_v14  ;;  %v646_v19 = vsel %vm315_vm0, %v644_v14, %v642_v34  ;;  %vm1624_vm0 = vcmp.eq.s32.totalorder %v1439_v28, 1 }
 0x218   : > { %930 = vmatprep.subr.msk.mxu1 %vm1623_vm13, %v645_v15 }
 0x219   : > { %931 = vmatpush1.msk.msra.mxu1 %vm335_vm9, %v646_v19 }
 0x21a   : > { %v636_v36 = vpop.permute.xlu1 %635 }
 0x21b   : > { %v637_v24 = vsel %vm287_vm2, %v634_v35, %v636_v36  ;;  %v638_v30 = vsel %vm287_vm2, %v636_v36, %v634_v35 }
 0x21c   : > { %932 = vmatprep.subr.msk.mxu1 %vm1624_vm0, %v637_v24 }
 0x21d   : > { %933 = vmatpush1.msk.msra.mxu1 %vm1625_vm4, %v638_v30 }
 0x21e   : > { %934 = vmatmul.mubr.msk.f32.vlgmr.msra.gmra.mxu1 %vm528_vm14, %v632_v38 }
 0x21f   : > { %v785_v63 = vpop.permute.xlu0 %784 }
 0x227   : > { %v801_v23 = vpop.permute.xlu1 %800 }
 0x22c   : > { %v807_v48 = vpop.permute.xlu1 %806 }
 0x22d   : > { %v809_v61 = vmul.f32 %v807_v48, %v1113_v1  ;;  %v810_v34 = vmul.f32 %v807_v48, %v1119_v2 }
 0x2de   : > { %v768_v0 = vpop.f32.mrf.mxu1 }
 0x2df   : > { %v773_v40 = vmul.f32 4096.0, %v768_v0 }
 0x2e0   : > { %v770_v41 = vpop.f32.mrf.mxu1 }
 0x2e1   : > { %v973_v42 = vcvt.f32.s32 %v773_v40  ;;  %v774_v43 = vmul.f32 4096.0, %v770_v41  ;;  %v971_v46 = vand.u32 2147483647, %v773_v40  ;;  %v976_v52 = vand.u32 2147483648, %v773_v40 }
 0x2e3   : > { %v974_v44 = vcvt.s32.f32 %v973_v42  ;;  %v981_v37 = vcvt.f32.s32 %v774_v43  ;;  %v979_v54 = vand.u32 2147483647, %v774_v43  ;;  %v984_v28 = vand.u32 2147483648, %v774_v43 }
 0x2e4   : > { %vm972_vm2 = vcmp.lt.f32.partialorder %v971_v46, 8388608.0 }
 0x2e5   : > { %v975_v50 = vand.u32 2147483647, %v974_v44  ;;  %v982_v53 = vcvt.s32.f32 %v981_v37  ;;  %vm980_vm9 = vcmp.lt.f32.partialorder %v979_v54, 8388608.0 }
 0x2e7   : > { %v983_v29 = vand.u32 2147483647, %v982_v53  ;;  %v977_v56 = vor.u32 %v976_v52, %v975_v50 }
 0x2e9   : > { %v978_v49 = vsel %vm972_vm2, %v977_v56, %v773_v40  ;;  %v985_v57 = vor.u32 %v984_v28, %v983_v29 }
 0x2ea   : > { %v777_v58 = vmax.f32 %v978_v49, -32768.0 }
 0x2eb   : > { %v986_v59 = vsel %vm980_vm9, %v985_v57, %v774_v43 }
 0x2ec   : > { %v778_v60 = vmax.f32 %v986_v59, -32768.0  ;;  %v779_v62 = vmin.f32 %v777_v58, 32767.0 }
 0x2ee   : > { %v780_v5 = vmin.f32 %v778_v60, 32767.0  ;;  %v781_v6 = vmul.f32 0.00024414063, %v779_v62 }
 0x2f0   : > { %v782_v7 = vmul.f32 0.00024414063, %v780_v5  ;;  %v787_v8 = vadd.f32 %v785_v63, %v781_v6 }
 0x2f2   : > { %v788_v9 = vadd.f32 %v785_v63, %v782_v7  ;;  %v789_v10 = vmul.f32 16.0, %v787_v8 }
 0x2f4   : > { %v790_v11 = vmul.f32 16.0, %v788_v9  ;;  %v989_v12 = vcvt.f32.s32 %v789_v10  ;;  %v987_v18 = vand.u32 2147483647, %v789_v10  ;;  %v992_v21 = vand.u32 2147483648, %v789_v10 }
 0x2f6   : > { %v990_v16 = vcvt.s32.f32 %v989_v12  ;;  %v997_v17 = vcvt.f32.s32 %v790_v11  ;;  %v995_v4 = vand.u32 2147483647, %v790_v11  ;;  %v1000_v26 = vand.u32 2147483648, %v790_v11 }
 0x2f7   : > { %vm988_vm14 = vcmp.lt.f32.partialorder %v987_v18, 8388608.0 }
 0x2f8   : > { %v991_v20 = vand.u32 2147483647, %v990_v16  ;;  %v998_v22 = vcvt.s32.f32 %v997_v17  ;;  %vm996_vm5 = vcmp.lt.f32.partialorder %v995_v4, 8388608.0 }
 0x2fa   : > { %v999_v25 = vand.u32 2147483647, %v998_v22  ;;  %v993_v39 = vor.u32 %v992_v21, %v991_v20 }
 0x2fc   : > { %v994_v45 = vsel %vm988_vm14, %v993_v39, %v789_v10  ;;  %v1001_v27 = vor.u32 %v1000_v26, %v999_v25 }
 0x2fd   : > { %v793_v31 = vmax.f32 %v994_v45, -128.0 }
 0x2fe   : > { %v1002_v47 = vsel %vm996_vm5, %v1001_v27, %v790_v11 }
 0x2ff   : > { %v794_v32 = vmax.f32 %v1002_v47, -128.0  ;;  %v795_v51 = vmin.f32 %v793_v31, 127.0 }
 0x301   : > { %v796_v55 = vmin.f32 %v794_v32, 127.0  ;;  %v797_v33 = vmul.f32 0.0625, %v795_v51 }
 0x303   : > { %v798_v3 = vmul.f32 0.0625, %v796_v55  ;;  %v803_v13 = vmul.f32 %v801_v23, %v797_v33 }
 0x305   : > { %v804_v14 = vmul.f32 %v801_v23, %v798_v3  ;;  %v811_v15 = vadd.f32 %v809_v61, %v803_v13 }
 0x307   : > { %v812_v19 = vadd.f32 %v810_v34, %v804_v14  ;;  %v813_v35 = vmul.f32 16.0, %v811_v15 }
 0x309   : > { %v814_v36 = vmul.f32 16.0, %v812_v19  ;;  %v1005_v24 = vcvt.f32.s32 %v813_v35  ;;  %v1003_v0 = vand.u32 2147483647, %v813_v35  ;;  %v1008_v41 = vand.u32 2147483648, %v813_v35 }
 0x30b   : > { %v1006_v30 = vcvt.s32.f32 %v1005_v24  ;;  %v1013_v38 = vcvt.f32.s32 %v814_v36  ;;  %v1011_v43 = vand.u32 2147483647, %v814_v36  ;;  %v1016_v37 = vand.u32 2147483648, %v814_v36 }
 0x30c   : > { %vm1004_vm10 = vcmp.lt.f32.partialorder %v1003_v0, 8388608.0 }
 0x30d   : > { %v1007_v40 = vand.u32 2147483647, %v1006_v30  ;;  %v1014_v42 = vcvt.s32.f32 %v1013_v38  ;;  %vm1012_vm7 = vcmp.lt.f32.partialorder %v1011_v43, 8388608.0 }
 0x30f   : > { %v1009_v44 = vor.u32 %v1008_v41, %v1007_v40  ;;  %v1015_v1 = vand.u32 2147483647, %v1014_v42 }
 0x311   : > { %v1010_v46 = vsel %vm1004_vm10, %v1009_v44, %v813_v35  ;;  %v1017_v2 = vor.u32 %v1016_v37, %v1015_v1 }
 0x312   : > { %v817_v50 = vmax.f32 %v1010_v46, -128.0 }
 0x313   : > { %v1018_v52 = vsel %vm1012_vm7, %v1017_v2, %v814_v36 }
 0x314   : > { %v818_v53 = vmax.f32 %v1018_v52, -128.0  ;;  %v819_v54 = vmin.f32 %v817_v50, 127.0 }
 0x316   : > { %v820_v29 = vmin.f32 %v818_v53, 127.0  ;;  %v821_v28 = vmul.f32 0.0625, %v819_v54 }
 0x318   : > { %v822_v56 = vmul.f32 0.0625, %v820_v29  ;;  %v823_v49 = vmax.f32 %v821_v28, 0.0 }
 0x31a   : > { %v824_v57 = vmax.f32 %v822_v56, 0.0  ;;  %825 = vst [vmem:[%s224_s17] sm:$0xff] %v823_v49 }
 0x31c   : > { %826 = vst [vmem:[%s224_s17 + $0x8] sm:$0xff] %v824_v57 }
 0x31d PF: > { %s15_s18 = sadd.s32 1, %s1051_s18  }
 0x31e   : > { %p12_p4 = scmp.ge.s32.totalorder %s15_s18, 4  }
 0x320   :  { %14 = sbr.rel (!%p12_p4) target bundleno = 1 (0x1), region = 70 }

</bundles_post_ra>
